<compile_context>
chip_gen: v6e
topology: v6e:2x2x1
jax: 0.10.0
libtpu: 0.0.40
codegen_flags: <defaults>
</compile_context>

<pallas_src>
import jax
import jax.numpy as jnp
from jax.experimental import pallas as pl
from jax.experimental.pallas import tpu as pltpu


def _round_up(x: int, m: int) -> int:
    return ((x + m - 1) // m) * m


def _hw_params():
    """Per-generation tile caps + scoped-VMEM limit (v7x has 64 MiB VMEM)."""
    try:
        vmem_cap = int(pltpu.get_tpu_info().vmem_capacity_bytes)
    except Exception:
        vmem_cap = 64 * 1024 * 1024              # conservative (v7x-sized) fallback
    big_vmem = vmem_cap >= 100 * 1024 * 1024     # v5e / v6e (128 MiB physical)
    tm_cap = 1024 if big_vmem else 512           # v7x: smaller M tiles
    tn_cap = 1024
    tk_cap = 512
    vmem_limit = 64 * 1024 * 1024 if big_vmem else 48 * 1024 * 1024
    return tm_cap, tn_cap, tk_cap, vmem_limit


def _tile_plan(user_dim: int, item_dim: int):
    """Deterministic tile/padding plan shared by weight prep and the forward."""
    tm_cap, tn_cap, tk_cap, vmem_limit = _hw_params()
    k_dim = user_dim + item_dim
    tk = min(_round_up(k_dim, 128), tk_cap)
    tn = min(_round_up(item_dim, 128), tn_cap)
    k_pad = _round_up(k_dim, tk)
    n_pad = _round_up(item_dim, tn)
    return dict(tm_cap=tm_cap, tk=tk, tn=tn, k_pad=k_pad, n_pad=n_pad,
                vmem_limit=vmem_limit)


def prepare_linearcg_weights(w_u2i, adj_matrix, *, compute_dtype=jnp.bfloat16):
    """ONE-TIME (parameter-init-time) weight prep: K-stack [W_u2i.T ; adj], pad, cast.

    w_u2i      : (item_dim, user_dim) float32  -- nn.Linear (out, in) weight layout
    adj_matrix : (item_dim, item_dim) float32
    returns    : (K_pad, N_pad) stacked weight in `compute_dtype`
    """
    item_dim, user_dim = w_u2i.shape
    assert adj_matrix.shape == (item_dim, item_dim)
    plan = _tile_plan(user_dim, item_dim)
    k_dim = user_dim + item_dim
    w_stack = jnp.concatenate([w_u2i.T, adj_matrix], axis=0)       # (U+I, item_dim)
    w_stack = jnp.pad(w_stack, ((0, plan["k_pad"] - k_dim),
                                (0, plan["n_pad"] - item_dim)))    # zero pads -> exact
    return w_stack.astype(compute_dtype)


def _linearcg_matmul_kernel(x_ref, w_ref, o_ref):
    @pl.when(pl.program_id(2) == 0)
    def _init():
        o_ref[...] = jnp.zeros_like(o_ref)

    # bf16 (or f32) operands on the MXU, f32 accumulation directly into the
    # VMEM-resident output tile (output BlockSpec is constant across k).
    o_ref[...] += jnp.dot(x_ref[...], w_ref[...],
                          preferred_element_type=jnp.float32)


def linearcg_forward(user_samples, item_samples, w_stacked, *, tm=None):
    """Fused LinearCG forward: user@W.T + item@adj, as one tiled matmul.

    user_samples : (B, user_dim) float32
    item_samples : (B, item_dim) float32
    w_stacked    : (K_pad, N_pad) from prepare_linearcg_weights (bf16 or f32)
    returns      : (B, item_dim) float32
    """
    assert user_samples.shape[0] == item_samples.shape[0]
    B, user_dim = user_samples.shape
    item_dim = item_samples.shape[1]
    k_dim = user_dim + item_dim

    plan = _tile_plan(user_dim, item_dim)
    tk, tn, k_pad, n_pad = plan["tk"], plan["tn"], plan["k_pad"], plan["n_pad"]
    assert w_stacked.shape == (k_pad, n_pad), (
        "w_stacked must come from prepare_linearcg_weights for these dims")
    compute_dtype = w_stacked.dtype

    if tm is None:
        tm = min(_round_up(B, 8), plan["tm_cap"])
    b_pad = _round_up(B, tm)

    # Stacked activations X = [user | item], cast to the MXU compute dtype.
    # Pad rows/cols are zeros and the weight's padded K rows are zeros too, so
    # the contraction is exact.  At production shapes with B % tm == 0 and
    # (U+I) % 128 == 0 the pad is a no-op.
    x = jnp.concatenate(
        [user_samples.astype(compute_dtype), item_samples.astype(compute_dtype)],
        axis=1)
    if x.shape != (b_pad, k_pad):
        x = jnp.pad(x, ((0, b_pad - B), (0, k_pad - k_dim)))

    n_m, n_n, n_k = b_pad // tm, n_pad // tn, k_pad // tk

    itemsize = jnp.dtype(compute_dtype).itemsize
    cost = pl.CostEstimate(
        flops=2 * B * item_dim * k_dim,
        transcendentals=0,
        bytes_accessed=(b_pad * k_pad * itemsize * n_n      # X re-read per N tile
                        + k_pad * n_pad * itemsize * n_m    # W re-read per M tile
                        + b_pad * n_pad * 4))               # output written once

    out_padded = pl.pallas_call(
        _linearcg_matmul_kernel,
        out_shape=jax.ShapeDtypeStruct((b_pad, n_pad), jnp.float32),
        grid_spec=pltpu.PrefetchScalarGridSpec(
            num_scalar_prefetch=0,
            grid=(n_m, n_n, n_k),
            in_specs=[pl.BlockSpec((tm, tk), lambda i, j, k: (i, k)),
                      pl.BlockSpec((tk, tn), lambda i, j, k: (k, j))],
            out_specs=pl.BlockSpec((tm, tn), lambda i, j, k: (i, j)),
        ),
        compiler_params=pltpu.CompilerParams(
            dimension_semantics=("parallel", "parallel", "arbitrary"),
            vmem_limit_bytes=plan["vmem_limit"],
        ),
        cost_estimate=cost,
    )(x, w_stacked)

    if (b_pad, n_pad) != (B, item_dim):
        out_padded = out_padded[:B, :item_dim]
    return out_padded


if __name__ == "__main__":
    # Small, deterministic synthetic setup consistent with LinearCG.__init__.
    # (At toy shapes the grid is (1,1,1); the tiling pays off at production
    #  B / item_dim in the hundreds-to-thousands.)
    B = 8
    user_dim = 16
    item_dim = 32

    key = jax.random.PRNGKey(0)
    k_adj, k_w, k_u, k_i = jax.random.split(key, 4)

    # Parameter init mirroring the module:
    #   adj_matrix ~ Normal(0, 0.15), shape (item_dim, item_dim)
    #   user2item Linear weight, shape (item_dim, user_dim)
    adj_matrix = 0.15 * jax.random.normal(k_adj, (item_dim, item_dim), dtype=jnp.float32)
    bound = 1.0 / (user_dim ** 0.5)
    w_u2i = jax.random.uniform(
        k_w, (item_dim, user_dim), minval=-bound, maxval=bound, dtype=jnp.float32)

    user_samples = jax.random.normal(k_u, (B, user_dim), dtype=jnp.float32)
    item_samples = jax.random.normal(k_i, (B, item_dim), dtype=jnp.float32)

    # Reference (same math as the PyTorch forward).
    ref = user_samples @ w_u2i.T + item_samples @ adj_matrix

    fwd = jax.jit(linearcg_forward)

    # f32 operand path: matches the PyTorch f32 forward tightly.
    w_f32 = prepare_linearcg_weights(w_u2i, adj_matrix, compute_dtype=jnp.float32)
    out_f32 = jax.block_until_ready(fwd(user_samples, item_samples, w_f32))
    assert out_f32.shape == (B, item_dim)
    assert jnp.allclose(out_f32, ref, atol=1e-5, rtol=1e-5), \
        float(jnp.max(jnp.abs(out_f32 - ref)))

    # bf16 operand path (default / perf-optimal): f32 accumulation, looser tol.
    w_bf16 = prepare_linearcg_weights(w_u2i, adj_matrix)   # bf16 by default
    out_bf16 = jax.block_until_ready(fwd(user_samples, item_samples, w_bf16))
    assert out_bf16.shape == (B, item_dim)
    assert jnp.allclose(out_bf16, ref, atol=5e-2, rtol=5e-2), \
        float(jnp.max(jnp.abs(out_bf16 - ref)))

    print("KERNEL_OK")
</pallas_src>

<mosaic_0001>
module attributes {stable_mosaic.version = 11 : i64} {
  func.func @_linearcg_matmul_kernel(%arg0: i32, %arg1: i32, %arg2: i32, %arg3: memref<8x128xf32, #tpu.memory_space<vmem>>, %arg4: memref<128x128xf32, #tpu.memory_space<vmem>>, %arg5: memref<8x128xf32, #tpu.memory_space<vmem>>) attributes {dimension_semantics = [#tpu.dimension_semantics<parallel>, #tpu.dimension_semantics<parallel>, #tpu.dimension_semantics<arbitrary>], iteration_bounds = array<i64: 1, 1, 1>, scalar_prefetch = 0 : i64, scratch_operands = 0 : i64, tpu.core_type = #tpu.core_type<tc>, window_params = [{transform_indices = @transform_0, window_bounds = array<i64: 8, 128>}, {transform_indices = @transform_1, window_bounds = array<i64: 128, 128>}, {transform_indices = @transform_2, window_bounds = array<i64: 8, 128>}]} {
    %c0_i32 = arith.constant 0 : i32
    %0 = arith.cmpi eq, %arg2, %c0_i32 : i32
    %1 = arith.extui %0 : i1 to i32
    %c0_i32_0 = arith.constant 0 : i32
    %2 = arith.cmpi ne, %1, %c0_i32_0 : i32
    scf.if %2 {
      %cst_8 = arith.constant 0.000000e+00 : f32
      %9 = vector.broadcast %cst_8 : f32 to vector<8x128xf32>
      %c0_9 = arith.constant 0 : index
      %c0_10 = arith.constant 0 : index
      %10 = vector.load %arg5[%c0_9, %c0_10] : memref<8x128xf32, #tpu.memory_space<vmem>>, vector<8x128xf32>
      tpu.vector_store %arg5[%c0_9, %c0_10], %9 {strides = array<i32>} : memref<8x128xf32, #tpu.memory_space<vmem>>, vector<8x128xf32>,
    } else {
    }
    %c0 = arith.constant 0 : index
    %c0_1 = arith.constant 0 : index
    %3 = vector.load %arg5[%c0, %c0_1] : memref<8x128xf32, #tpu.memory_space<vmem>>, vector<8x128xf32>
    %c0_2 = arith.constant 0 : index
    %c0_3 = arith.constant 0 : index
    %4 = vector.load %arg3[%c0_2, %c0_3] : memref<8x128xf32, #tpu.memory_space<vmem>>, vector<8x128xf32>
    %c0_4 = arith.constant 0 : index
    %c0_5 = arith.constant 0 : index
    %5 = vector.load %arg4[%c0_4, %c0_5] : memref<128x128xf32, #tpu.memory_space<vmem>>, vector<128x128xf32>
    %cst = arith.constant dense<0.000000e+00> : vector<8x128xf32>
    %6 = tpu.matmul %4, %5, %cst {dimension_numbers = #tpu.dot_dimension_numbers<[1], [0], [0], [1], [0, 0, 1, 1], [], []>} : vector<8x128xf32>, vector<128x128xf32>, vector<8x128xf32> -> vector<8x128xf32>
    %7 = arith.addf %3, %6 : vector<8x128xf32>
    %c0_6 = arith.constant 0 : index
    %c0_7 = arith.constant 0 : index
    %8 = vector.load %arg5[%c0_6, %c0_7] : memref<8x128xf32, #tpu.memory_space<vmem>>, vector<8x128xf32>
    tpu.vector_store %arg5[%c0_6, %c0_7], %7 {strides = array<i32>} : memref<8x128xf32, #tpu.memory_space<vmem>>, vector<8x128xf32>,
    return
  }
  func.func @transform_0(%arg0: i32, %arg1: i32, %arg2: i32) -> (i32, i32) {
    %c0_i32 = arith.constant 0 : i32
    return %arg0, %arg2 : i32, i32
  }
  func.func @transform_1(%arg0: i32, %arg1: i32, %arg2: i32) -> (i32, i32) {
    %c0_i32 = arith.constant 0 : i32
    return %arg2, %arg1 : i32, i32
  }
  func.func @transform_2(%arg0: i32, %arg1: i32, %arg2: i32) -> (i32, i32) {
    %c0_i32 = arith.constant 0 : i32
    return %arg0, %arg1 : i32, i32
  }
}

</mosaic_0001>

<bundles_post_ra>
// kernel: linearcg_forward.1
= control target key start
LH: loop header
LB: loop body
LE: loop exit
PB: predicated region body
PF: predicated region fallthrough
CT: control target
= control target key end

     0   :  { %7 = vsyncpa [#allocation3], 0  ;;  %s268_s0 = inlined_call_operand.vmem [shape: f32[8,128], index: 0, kind: input, shape index: {}]   ;;  %s269_s1 = inlined_call_operand.hbm [shape: f32[128,128], index: 1, kind: input, shape index: {}]   ;;  %s270_s2 = inlined_call_operand.hbm [shape: f32[8,128], index: 2, kind: output, shape index: {}]  }
   0x1   :  { %8 = vsyncpa [#allocation4], 0  ;;  %s238_s9 = smov [#allocation2]  }
   0x2   :  { %s16_s10 = sshll.u32 %s238_s9, 4  ;;  %s17_s10 = int_to_ptr.vmem [resolvable:$true] %s16_s10 }
   0x3   :  { %s202_s11 = scalar_lea.vmem %s17_s10, 2048  ;;  %p207_p1 = scmp.lt.s32.totalorder %s17_s10, %s17_s10 }
   0x4   :  { %p203_p0 = scmp.ne.s32.totalorder %s17_s10, %s202_s11  ;;  %p208_p2 = scmp.lt.s32.totalorder %s202_s11, %s202_s11 }
   0x6   :  { %p209_p3 = por %p208_p2, %p207_p1 }
   0x8   :  { %p210_p4 = pnand %p209_p3, %p203_p0 }
   0xa   :  { %213 = shalt.err (!%p210_p4)
}
   0xb   :  { %s239_s12 = smov 128   ;;  %s240_s13 = smov 8  }
   0xc   :  { %22 = dma.hbm_to_vmem [thread:$0]  %s269_s1, 2048, %s17_s10, [#allocation3], %s239_s12, %s239_s12, %s240_s13  }
   0xd   :  { %234 = dma.done.wait [#allocation3], 2048  }
   0xe   :  { %235 = vsyncadd [#allocation3], 4294965248  ;;  %v241_v0 = vmov 0.0   ;;  %vm242_vm0 = vmmov 0   ;;  %v48_v1 = vld [vmem:[#allocation2 + $0x78] sm:$0xff]  ;;  %v47_v2 = vld [vmem:[#allocation2 + $0x70] sm:$0xff] }
   0xf   :  { %153 = vmatprep.subr.mxu0 %v241_v0  ;;  %185 = vmatprep.mubr.msk.f32.mxu0 %vm242_vm0, %v241_v0  ;;  %v46_v3 = vld [vmem:[#allocation2 + $0x68] sm:$0xff]  ;;  %v45_v4 = vld [vmem:[#allocation2 + $0x60] sm:$0xff]  ;;  %v44_v5 = vld [vmem:[#allocation2 + $0x58] sm:$0xff]  ;;  %s243_s17 = smov [#allocation5]  }
  0x10   :  { %154 = vmatpush3.msra.mxu0 %v48_v1  ;;  %v43_v6 = vld [vmem:[#allocation2 + $0x50] sm:$0xff]  ;;  %v42_v7 = vld [vmem:[#allocation2 + $0x48] sm:$0xff]  ;;  %v41_v8 = vld [vmem:[#allocation2 + $0x40] sm:$0xff]  ;;  %s127_s18 = sshll.u32 %s243_s17, 4  ;;  %s128_s18 = int_to_ptr.vmem [resolvable:$true] %s127_s18 }
  0x11   :  { %155 = vmatprep.subr.mxu0 %v241_v0  ;;  %v40_v9 = vld [vmem:[#allocation2 + $0x38] sm:$0xff]  ;;  %v39_v10 = vld [vmem:[#allocation2 + $0x30] sm:$0xff]  ;;  %v38_v11 = vld [vmem:[#allocation2 + $0x28] sm:$0xff]  ;;  %s214_s19 = scalar_lea.vmem %s128_s18, 128  ;;  %p219_p6 = scmp.lt.s32.totalorder %s128_s18, %s128_s18 }
  0x12   :  { %156 = vmatpush3.msra.mxu0 %v47_v2  ;;  %v37_v12 = vld [vmem:[#allocation2 + $0x20] sm:$0xff]  ;;  %v36_v13 = vld [vmem:[#allocation2 + $0x18] sm:$0xff]  ;;  %v35_v14 = vld [vmem:[#allocation2 + $0x10] sm:$0xff]  ;;  %p215_p5 = scmp.ne.s32.totalorder %s128_s18, %s214_s19  ;;  %p220_p7 = scmp.lt.s32.totalorder %s214_s19, %s214_s19 }
  0x13   :  { %157 = vmatprep.subr.mxu0 %v241_v0  ;;  %v34_v15 = vld [vmem:[#allocation2 + $0x8] sm:$0xff]  ;;  %v33_v16 = vld [vmem:[#allocation2] sm:$0xff] }
  0x14   :  { %158 = vmatpush3.msra.mxu0 %v46_v3  ;;  %v32_v17 = vld [vmem:[%s268_s0] sm:$0xff]  ;;  %p221_p8 = por %p220_p7, %p219_p6 }
  0x15   :  { %159 = vmatprep.subr.mxu0 %v241_v0 }
  0x16   :  { %160 = vmatpush3.msra.mxu0 %v45_v4  ;;  %p222_p9 = pnand %p221_p8, %p215_p5 }
  0x17   :  { %161 = vmatprep.subr.mxu0 %v241_v0 }
  0x18   :  { %162 = vmatpush3.msra.mxu0 %v44_v5 }
  0x19   :  { %163 = vmatprep.subr.mxu0 %v241_v0 }
  0x1a   :  { %164 = vmatpush3.msra.mxu0 %v43_v6 }
  0x1b   :  { %165 = vmatprep.subr.mxu0 %v241_v0 }
  0x1c   :  { %166 = vmatpush3.msra.mxu0 %v42_v7 }
  0x1d   :  { %167 = vmatprep.subr.mxu0 %v241_v0 }
  0x1e   :  { %168 = vmatpush3.msra.mxu0 %v41_v8 }
  0x1f   :  { %169 = vmatprep.subr.mxu0 %v241_v0 }
  0x20   :  { %170 = vmatpush3.msra.mxu0 %v40_v9 }
  0x21   :  { %171 = vmatprep.subr.mxu0 %v241_v0 }
  0x22   :  { %172 = vmatpush3.msra.mxu0 %v39_v10 }
  0x23   :  { %173 = vmatprep.subr.mxu0 %v241_v0 }
  0x24   :  { %174 = vmatpush3.msra.mxu0 %v38_v11 }
  0x25   :  { %175 = vmatprep.subr.mxu0 %v241_v0 }
  0x26   :  { %176 = vmatpush3.msra.mxu0 %v37_v12 }
  0x27   :  { %177 = vmatprep.subr.mxu0 %v241_v0 }
  0x28   :  { %178 = vmatpush3.msra.mxu0 %v36_v13 }
  0x29   :  { %179 = vmatprep.subr.mxu0 %v241_v0 }
  0x2a   :  { %180 = vmatpush3.msra.mxu0 %v35_v14 }
  0x2b   :  { %181 = vmatprep.subr.mxu0 %v241_v0 }
  0x2c   :  { %182 = vmatpush3.msra.mxu0 %v34_v15 }
  0x2d   :  { %183 = vmatprep.subr.mxu0 %v241_v0 }
  0x2e   :  { %184 = vmatpush3.msra.mxu0 %v33_v16 }
  0x2f   :  { %186 = vmatmul.mubr.f32.vlgmr.msra.gmra.mxu0 %v32_v17 }
  0xef   :  { %v115_v18 = vpop.f32.mrf.mxu0 }
  0xf0   :  { %120 = vst [vmem:[#allocation5] sm:$0xff] %v115_v18 }
  0xf1   :  { %v187_v19 = vpop.f32.mrf.mxu0 }
  0xf2   :  { %225 = shalt.err (!%p222_p9)
}
  0xf3   :  { %130 = dma.vmem_to_hbm [thread:$0]  %s128_s18, 128, %s270_s2, [#allocation4]  }
  0xf4   :  { %236 = dma.done.wait [#allocation4], 128  }
  0xf5   :  { %237 = vsyncadd [#allocation4], 4294967168 }
  0xf6   :  { %134 = vsyncpa [#allocation3], 1 }
  0xf7   :  { %135 = vsyncpa [#allocation4], 1 }

</bundles_post_ra>
